<compile_context>
chip_gen: v7x
topology: tpu7x:2x2x1
jax: 0.10.0
libtpu: 0.0.40
codegen_flags: <defaults>
</compile_context>

<pallas_src>
import jax
import jax.numpy as jnp
from jax.experimental import pallas as pl
from jax.experimental.pallas import tpu as pltpu

_MiB = 1024 * 1024


def _round_up(v, m):
    return (v + m - 1) // m * m


def _vmem_capacity_bytes():
    """Per-TensorCore VMEM capacity; conservative fallback if the query fails."""
    try:
        info = pltpu.get_tpu_info()
        cap = int(getattr(info, "vmem_capacity_bytes", 0))
        if cap > 0:
            return cap
    except Exception:
        pass
    return 64 * _MiB          # v7x has the smallest VMEM (64 MiB / TC)


def _lane_tile_divisor(dim, cap_lanes=2048):
    """Largest multiple of 128 that divides `dim`, capped at `cap_lanes`.
    Falls back to the full dim when it is not a multiple of 128 (a full-extent
    block is always legal)."""
    if dim % 128 != 0:
        return dim
    t = dim // 128
    for m in range(min(t, cap_lanes // 128), 0, -1):
        if t % m == 0:
            return 128 * m
    return 128


def _sublane_tile(dim, lane, dtype_bytes, target_bytes, align):
    """Second-to-last block dim: multiple of `align`, sized so one block moves
    roughly `target_bytes`; only clamped by the (rounded) array extent."""
    budget_rows = max(align, (target_bytes // (lane * dtype_bytes)) // align * align)
    return max(align, min(_round_up(dim, align), budget_rows))


def _make_fusion_kernel(n_add, weighted, na_clip, tc, c_axis):
    """o = w0*x + sum_i w_{i+1}*a_i   (or plain sum if not weighted).

    na_clip[i] is None when a_i covers every output channel of its block;
    otherwise it is a_i's channel count (nx > na case): the clamped index_map
    may have fetched channel rows of a_i past its extent (garbage), so those
    rows are zero-masked before the add (== PyTorch x[:, :na] += a).
    """
    any_clip = any(clip is not None for clip in na_clip)

    def kernel(*refs):
        if weighted:
            w_ref = refs[0]                      # (n,) f32 in SMEM
            x_ref = refs[1]
            a_refs = refs[2:2 + n_add]
            o_ref = refs[2 + n_add]
        else:
            x_ref = refs[0]
            a_refs = refs[1:1 + n_add]
            o_ref = refs[1 + n_add]

        acc = x_ref[...].astype(jnp.float32)
        if weighted:
            acc = acc * w_ref[0]

        row = None
        if any_clip:
            c_blk = pl.program_id(c_axis)
            row = jax.lax.broadcasted_iota(jnp.int32, acc.shape, 1) + c_blk * tc

        for i, a_ref in enumerate(a_refs):
            contrib = a_ref[...].astype(jnp.float32)
            if weighted:
                contrib = contrib * w_ref[i + 1]
            if na_clip[i] is not None:
                # GUARD: contrib may contain garbage rows (clamped OOB fetch of
                # a_i).  They must be masked BEFORE any add/reduce/store.
                contrib = jnp.where(row < na_clip[i], contrib, 0.0)
            acc = acc + contrib

        o_ref[...] = acc.astype(o_ref.dtype)

    return kernel


def weighted_feature_fusion(x, outputs, layers, w_param=None, *, donate_x=False):
    """JAX/Pallas equivalent of Weighted_Feature_Fusion.forward.

    x:        (N, C, H, W)
    outputs:  list of (N, C_i, H, W) tensors
    layers:   python list of indices into `outputs`
    w_param:  (len(layers)+1,) raw parameter (pre-sigmoid) or None (weight=False)
    donate_x: alias the output onto x's buffer (only if x is dead afterwards).
    """
    n = len(layers) + 1
    weighted = w_param is not None
    N, nx, H, W = x.shape
    HW = H * W
    dt_bytes = jnp.dtype(x.dtype).itemsize
    # dtype-aware sublane alignment: 8 for f32, 16 for bf16/f16, 32 for int8/fp8.
    sub_align = max(8, 32 // max(dt_bytes, 1))

    a_raw = [outputs[layers[i]] for i in range(n - 1)]
    na_list = [int(a.shape[1]) for a in a_raw]
    n_add = len(a_raw)
    all_match = all(na == nx for na in na_list)

    # ---- per-stream block budget, sized from this generation's VMEM ----------
    streams = n_add + 2                        # x + fused adds + output
    vmem_cap = _vmem_capacity_bytes()
    target_block_bytes = max(256 * 1024,
                             min(2 * _MiB, int(0.35 * vmem_cap) // streams))

    if all_match:
        # ---------- 2-D fast path: every tensor has nx channels --------------
        total = N * nx * HW
        if HW % 128 == 0:
            rows, cols = N * nx, HW
            thw = _lane_tile_divisor(HW)
        elif total % 128 == 0:
            # HW not lane-dense (e.g. 13x13=169): fully flatten and re-fold to a
            # 128-multiple lane width (metadata-only reshape; op is elementwise).
            cols = _lane_tile_divisor(total)
            rows = total // cols
            thw = cols
        else:
            rows, cols = N * nx, HW
            thw = HW                        # full-extent block (always legal)

        x_in = x.reshape(rows, cols)
        a_in = [a.reshape(rows, cols) for a in a_raw]
        tr = _sublane_tile(rows, thw, dt_bytes, target_block_bytes, sub_align)
        gr, gh = pl.cdiv(rows, tr), pl.cdiv(cols, thw)
        # v7x megacore: make sure both TensorCores get work when possible.
        if gr * gh < 2 and rows >= 2 * sub_align:
            tr = _round_up(pl.cdiv(rows, 2), sub_align)
            gr = pl.cdiv(rows, tr)
        grid = (gr, gh)
        blk = (tr, thw)
        idx = lambda r, h: (r, h)
        feat_specs = [pl.BlockSpec(blk, idx) for _ in range(1 + n_add)]
        out_spec = pl.BlockSpec(blk, idx)
        na_clip = [None] * n_add
        tc, c_axis = tr, 0                  # unused (no clipped inputs)
        out_shape_flat = (rows, cols)
        dims = ("parallel", "parallel")
        block_bytes = tr * thw * dt_bytes
    else:
        # ---------- 3-D path: channel mismatch handled in-kernel -------------
        x_in = x.reshape(N, nx, HW)
        a_in = [a.reshape(a.shape[0], a.shape[1], HW) for a in a_raw]
        thw = _lane_tile_divisor(HW)
        tc = _sublane_tile(nx, thw, dt_bytes, target_block_bytes, sub_align)
        if N * pl.cdiv(nx, tc) * pl.cdiv(HW, thw) < 2 and nx >= 2 * sub_align:
            tc = _round_up(pl.cdiv(nx, 2), sub_align)     # keep both TCs busy
        any_clip = any(na < nx for na in na_list)
        blk = (1, tc, thw)

        if any_clip:
            # Channel-tile axis innermost: the clamped index_map then returns
            # the SAME block index on consecutive steps past na, so the Pallas
            # pipeline keeps that tile resident instead of re-DMAing it.
            grid = (N, pl.cdiv(HW, thw), pl.cdiv(nx, tc))
            c_axis = 2
            out_idx = lambda b, h, c: (b, c, h)
        else:
            grid = (N, pl.cdiv(nx, tc), pl.cdiv(HW, thw))
            c_axis = 1
            out_idx = lambda b, c, h: (b, c, h)

        out_spec = pl.BlockSpec(blk, out_idx)
        feat_specs = [pl.BlockSpec(blk, out_idx)]          # x
        na_clip = []
        for na in na_list:
            if na >= nx:
                # na == nx or na > nx ("x += a[:, :nx]"): walk the same channel
                # tiles as the output -- channels of a beyond the output range
                # are simply never fetched (no wrapper slice needed).
                feat_specs.append(pl.BlockSpec(blk, out_idx))
                na_clip.append(None)
            else:
                # na < nx ("x[:, :na] += a"): clamp the channel-tile index into
                # a's range and zero-mask rows >= na inside the kernel (no
                # wrapper-side jnp.pad -> no extra HBM pass).
                last = pl.cdiv(na, tc) - 1
                feat_specs.append(pl.BlockSpec(
                    blk, lambda b, h, c, last=last: (b, jnp.minimum(c, last), h)))
                na_clip.append(na)
        out_shape_flat = (N, nx, HW)
        dims = ("parallel", "parallel", "parallel")
        block_bytes = tc * thw * dt_bytes

    kernel = _make_fusion_kernel(n_add, weighted, na_clip, tc, c_axis)

    if weighted:
        w_scaled = jax.nn.sigmoid(w_param.astype(jnp.float32)) * (2.0 / n)
        in_specs = [pl.BlockSpec(memory_space=pltpu.MemorySpace.SMEM)] + feat_specs
        args = (w_scaled, x_in, *a_in)
        x_arg_idx = 1
    else:
        in_specs = list(feat_specs)
        args = (x_in, *a_in)
        x_arg_idx = 0

    # Explicit VMEM limit: double-buffered streams + headroom, capped at ~90% of
    # physical so the larger tiles survive on v5e (16 MiB scoped default) and
    # never overshoot v7x's 64 MiB.
    vmem_limit = int(min(0.9 * vmem_cap,
                         max(2 * streams * block_bytes + 4 * _MiB, 32 * _MiB)))

    elems_out = N * nx * HW
    bytes_in = sum(int(t.size) for t in (x_in, *a_in)) * dt_bytes
    cost = pl.CostEstimate(
        flops=int((1 + 2 * n_add) if weighted else n_add) * elems_out,
        transcendentals=0,
        bytes_accessed=int(bytes_in + elems_out * dt_bytes))

    out_flat = pl.pallas_call(
        kernel,
        out_shape=jax.ShapeDtypeStruct(out_shape_flat, x.dtype),
        grid=grid,
        in_specs=in_specs,
        out_specs=out_spec,
        input_output_aliases=({x_arg_idx: 0} if donate_x else {}),
        cost_estimate=cost,
        compiler_params=pltpu.CompilerParams(
            dimension_semantics=dims,
            vmem_limit_bytes=vmem_limit),
    )(*args)

    return out_flat.reshape(N, nx, H, W)


def _reference(x, outputs, layers, w_param=None):
    """Pure-JAX reference mirroring the PyTorch forward exactly."""
    n = len(layers) + 1
    if w_param is not None:
        w = jax.nn.sigmoid(w_param) * (2.0 / n)
        x = x * w[0]
    nx = x.shape[1]
    for i in range(n - 1):
        a = outputs[layers[i]] * w[i + 1] if w_param is not None else outputs[layers[i]]
        na = a.shape[1]
        if nx == na:
            x = x + a
        elif nx > na:
            x = x.at[:, :na].add(a)
        else:
            x = x + a[:, :nx]
    return x


if __name__ == "__main__":
    key = jax.random.PRNGKey(0)
    N, C, H, W = 2, 4, 16, 16

    # Module config: fuse 3 earlier layers -> n = 4 weights, weight=True.
    layers = [2, 4, 5]
    n = len(layers) + 1

    keys = jax.random.split(key, 10)
    w_param = jax.random.normal(keys[7], (n,), dtype=jnp.float32) * 0.5

    x = jax.random.normal(keys[0], (N, C, H, W), dtype=jnp.float32)
    outputs = [
        jax.random.normal(keys[1], (N, C, H, W), dtype=jnp.float32),      # equal C
        jax.random.normal(keys[2], (N, C, H, W), dtype=jnp.float32),      # unused
        jax.random.normal(keys[3], (N, C, H, W), dtype=jnp.float32),      # na == nx
        jax.random.normal(keys[4], (N, C, H, W), dtype=jnp.float32),      # unused
        jax.random.normal(keys[5], (N, C + 2, H, W), dtype=jnp.float32),  # na >  nx
        jax.random.normal(keys[6], (N, C - 2, H, W), dtype=jnp.float32),  # na <  nx
    ]

    # Mixed-channel case (3-D masked path, channel axis innermost), weighted.
    out = jax.block_until_ready(weighted_feature_fusion(x, outputs, layers, w_param))
    ref = _reference(x, outputs, layers, w_param)
    assert out.shape == ref.shape and out.dtype == ref.dtype
    assert jnp.allclose(out, ref, atol=1e-5, rtol=1e-5)

    # Mixed-channel case, weight=False.
    out_nw = jax.block_until_ready(weighted_feature_fusion(x, outputs, layers, None))
    ref_nw = _reference(x, outputs, layers, None)
    assert jnp.allclose(out_nw, ref_nw, atol=1e-5, rtol=1e-5)

    # Equal-channel case, HW % 128 == 0 (flattened 2-D fast path), weighted.
    layers_eq = [0, 2]
    w_eq = jax.random.normal(keys[8], (len(layers_eq) + 1,), dtype=jnp.float32) * 0.5
    out_eq = jax.block_until_ready(weighted_feature_fusion(x, outputs, layers_eq, w_eq))
    ref_eq = _reference(x, outputs, layers_eq, w_eq)
    assert jnp.allclose(out_eq, ref_eq, atol=1e-5, rtol=1e-5)

    # Equal-channel case, HW % 128 != 0 but total % 128 == 0 (fully-flattened
    # 128-multiple lane re-fold path), weighted.
    x2 = jax.random.normal(keys[9], (N, C, 12, 12), dtype=jnp.float32)
    outs2 = [jax.random.normal(jax.random.fold_in(key, i), (N, C, 12, 12),
                               dtype=jnp.float32) for i in range(3)]
    layers2 = [0, 2]
    out2 = jax.block_until_ready(weighted_feature_fusion(x2, outs2, layers2, w_eq))
    ref2 = _reference(x2, outs2, layers2, w_eq)
    assert jnp.allclose(out2, ref2, atol=1e-5, rtol=1e-5)

    print("KERNEL_OK")
</pallas_src>

<mosaic_0001>
module attributes {stable_mosaic.version = 11 : i64} {
  func.func @kernel(%arg0: i32, %arg1: i32, %arg2: i32, %arg3: memref<4xf32, #tpu.memory_space<smem>>, %arg4: memref<1x8x256xf32, #tpu.memory_space<vmem>>, %arg5: memref<1x8x256xf32, #tpu.memory_space<vmem>>, %arg6: memref<1x8x256xf32, #tpu.memory_space<vmem>>, %arg7: memref<1x8x256xf32, #tpu.memory_space<vmem>>, %arg8: memref<1x8x256xf32, #tpu.memory_space<vmem>>) attributes {dimension_semantics = [#tpu.dimension_semantics<parallel>, #tpu.dimension_semantics<parallel>, #tpu.dimension_semantics<parallel>], iteration_bounds = array<i64: 2, 1, 1>, scalar_prefetch = 0 : i64, scratch_operands = 0 : i64, tpu.core_type = #tpu.core_type<tc>, window_params = [{transform_indices = @transform_0, window_bounds = array<i64: 4>}, {transform_indices = @transform_1, window_bounds = array<i64: 1, 8, 256>}, {transform_indices = @transform_2, window_bounds = array<i64: 1, 8, 256>}, {transform_indices = @transform_3, window_bounds = array<i64: 1, 8, 256>}, {transform_indices = @transform_4, window_bounds = array<i64: 1, 8, 256>}, {transform_indices = @transform_5, window_bounds = array<i64: 1, 8, 256>}]} {
    %c0 = arith.constant 0 : index
    %c0_0 = arith.constant 0 : index
    %c0_1 = arith.constant 0 : index
    %0 = vector.load %arg4[%c0, %c0_0, %c0_1] : memref<1x8x256xf32, #tpu.memory_space<vmem>>, vector<1x8x256xf32>
    %c0_2 = arith.constant 0 : index
    %1 = memref.load %arg3[%c0_2] : memref<4xf32, #tpu.memory_space<smem>>
    %2 = vector.broadcast %1 : f32 to vector<1x8x256xf32>
    %3 = arith.mulf %0, %2 : vector<1x8x256xf32>
    %4 = tpu.iota {dimensions = array<i32: 1>} : vector<1x8x256xi32>
    %c8_i32 = arith.constant 8 : i32
    %5 = arith.muli %arg2, %c8_i32 : i32
    %6 = vector.broadcast %5 : i32 to vector<1x8x256xi32>
    %7 = arith.addi %4, %6 : vector<1x8x256xi32>
    %c0_3 = arith.constant 0 : index
    %c0_4 = arith.constant 0 : index
    %c0_5 = arith.constant 0 : index
    %8 = vector.load %arg5[%c0_3, %c0_4, %c0_5] : memref<1x8x256xf32, #tpu.memory_space<vmem>>, vector<1x8x256xf32>
    %c1 = arith.constant 1 : index
    %9 = memref.load %arg3[%c1] : memref<4xf32, #tpu.memory_space<smem>>
    %10 = vector.broadcast %9 : f32 to vector<1x8x256xf32>
    %11 = arith.mulf %8, %10 : vector<1x8x256xf32>
    %12 = arith.addf %3, %11 : vector<1x8x256xf32>
    %c0_6 = arith.constant 0 : index
    %c0_7 = arith.constant 0 : index
    %c0_8 = arith.constant 0 : index
    %13 = vector.load %arg6[%c0_6, %c0_7, %c0_8] : memref<1x8x256xf32, #tpu.memory_space<vmem>>, vector<1x8x256xf32>
    %c2 = arith.constant 2 : index
    %14 = memref.load %arg3[%c2] : memref<4xf32, #tpu.memory_space<smem>>
    %15 = vector.broadcast %14 : f32 to vector<1x8x256xf32>
    %16 = arith.mulf %13, %15 : vector<1x8x256xf32>
    %17 = arith.addf %12, %16 : vector<1x8x256xf32>
    %c0_9 = arith.constant 0 : index
    %c0_10 = arith.constant 0 : index
    %c0_11 = arith.constant 0 : index
    %18 = vector.load %arg7[%c0_9, %c0_10, %c0_11] : memref<1x8x256xf32, #tpu.memory_space<vmem>>, vector<1x8x256xf32>
    %c3 = arith.constant 3 : index
    %19 = memref.load %arg3[%c3] : memref<4xf32, #tpu.memory_space<smem>>
    %20 = vector.broadcast %19 : f32 to vector<1x8x256xf32>
    %21 = arith.mulf %18, %20 : vector<1x8x256xf32>
    %c2_i32 = arith.constant 2 : i32
    %22 = vector.broadcast %c2_i32 : i32 to vector<1x8x256xi32>
    %23 = arith.cmpi slt, %7, %22 : vector<1x8x256xi32>
    %cst = arith.constant 0.000000e+00 : f32
    %24 = vector.broadcast %cst : f32 to vector<1x8x256xf32>
    %25 = arith.select %23, %21, %24 : vector<1x8x256xi1>, vector<1x8x256xf32>
    %26 = arith.addf %17, %25 : vector<1x8x256xf32>
    %c0_12 = arith.constant 0 : index
    %c0_13 = arith.constant 0 : index
    %c0_14 = arith.constant 0 : index
    %27 = vector.load %arg8[%c0_12, %c0_13, %c0_14] : memref<1x8x256xf32, #tpu.memory_space<vmem>>, vector<1x8x256xf32>
    tpu.vector_store %arg8[%c0_12, %c0_13, %c0_14], %26 {strides = array<i32>} : memref<1x8x256xf32, #tpu.memory_space<vmem>>, vector<1x8x256xf32>,
    return
  }
  func.func @transform_0(%arg0: i32, %arg1: i32, %arg2: i32) -> i32 {
    %c0_i32 = arith.constant 0 : i32
    %c0_i32_0 = arith.constant 0 : i32
    return %c0_i32 : i32
  }
  func.func @transform_1(%arg0: i32, %arg1: i32, %arg2: i32) -> (i32, i32, i32) {
    %c0_i32 = arith.constant 0 : i32
    return %arg0, %arg2, %arg1 : i32, i32, i32
  }
  func.func @transform_2(%arg0: i32, %arg1: i32, %arg2: i32) -> (i32, i32, i32) {
    %c0_i32 = arith.constant 0 : i32
    return %arg0, %arg2, %arg1 : i32, i32, i32
  }
  func.func @transform_3(%arg0: i32, %arg1: i32, %arg2: i32) -> (i32, i32, i32) {
    %c0_i32 = arith.constant 0 : i32
    return %arg0, %arg2, %arg1 : i32, i32, i32
  }
  func.func @transform_4(%arg0: i32, %arg1: i32, %arg2: i32) -> (i32, i32, i32) {
    %c0_i32 = arith.constant 0 : i32
    %0 = arith.minsi %arg2, %c0_i32 : i32
    %c0_i32_0 = arith.constant 0 : i32
    return %arg0, %0, %arg1 : i32, i32, i32
  }
  func.func @transform_5(%arg0: i32, %arg1: i32, %arg2: i32) -> (i32, i32, i32) {
    %c0_i32 = arith.constant 0 : i32
    return %arg0, %arg2, %arg1 : i32, i32, i32
  }
}

</mosaic_0001>

<bundles_post_ra>
// kernel: tpu_custom_call.1
= control target key start
LH: loop header
LB: loop body
LE: loop exit
PB: predicated region body
PF: predicated region fallthrough
CT: control target
= control target key end

     0   :  { %s1173_s0 = inlined_call_operand.vmem [shape: f32[4], index: 0, kind: input, shape index: {}]   ;;  %s1174_s1 = inlined_call_operand.vmem [shape: f32[2,4,256], index: 1, kind: input, shape index: {}]   ;;  %s1175_s2 = inlined_call_operand.vmem [shape: f32[2,4,256], index: 2, kind: input, shape index: {}]   ;;  %s1176_s3 = inlined_call_operand.vmem [shape: f32[2,6,256], index: 3, kind: input, shape index: {}]   ;;  %s1177_s4 = inlined_call_operand.vmem [shape: f32[2,2,256], index: 4, kind: input, shape index: {}]   ;;  %s1178_s5 = inlined_call_operand.hbm [shape: f32[2,4,256], index: 5, kind: output, shape index: {}]  }
   0x1   :  { %1182 = sst [smem:[#allocation12_spill]] %s1173_s0 }
   0x2   :  { %10 = vsyncpa [#allocation4], 0 }
   0x3   :  { %11 = vsyncpa [#allocation3], 0 }
   0x4   :  { %13 = vsyncpa [#allocation3 + $0x1], 0  ;;  %s1024_s18 = smov 0   ;;  %s1026_s19 = smov 0  }
   0x5   :  { %s1028_s20 = smov 0   ;;  %s1030_s21 = smov 0  }
   0x6   :  { %s1032_s22 = smov 0   ;;  %s1034_s23 = smov 0  }
   0x7 LB: > { %1183 = sst [smem:[#allocation8_spill]] %s975_s20  ;;  %s797_s24 = sadd.s32 4294967295, %s987_s23   ;;  %s987_s23 = sphi %s1034_s23, %s19_s23   ;;  %s983_s22 = sphi %s1032_s22, %s1200_s22   ;;  %s979_s21 = sphi %s1030_s21, %s1196_s21   ;;  %s975_s20 = sphi %s1028_s20, %s1195_s20   ;;  %s971_s19 = sphi %s1026_s19, %s1199_s19   ;;  %s967_s18 = sphi %s1024_s18, %s1198_s18  }
   0x8   : > { %1184 = sst [smem:[#allocation9_spill]] %s983_s22  ;;  %s798_s25 = sadd.s32 4294967294, %s987_s23  }
   0x9   : > { %s38_s26 = sadd.s32 1, %s983_s22  ;;  %s194_s27 = sadd.s32 1, %s975_s20 }
   0xa   : > { %p40_p0 = scmp.ge.s32.totalorder %s38_s26, 2  ;;  %p204_p1 = scmp.ne.s32.totalorder %s975_s20, %s971_s19 }
   0xb   : > { %p205_p2 = scmp.eq.s32.totalorder %s797_s24, 1  ;;  %p210_p3 = scmp.ne.s32.totalorder %s971_s19, %s967_s18 }
   0xc   : > { %s1202_s26 = smov (%p40_p0, %s38_s26), 0  ;;  %p211_p5 = scmp.eq.s32.totalorder %s798_s25, 1 }
   0xd   : > { %1185 = sst [smem:[#allocation10_spill]] %s1202_s26  ;;  %p1064_p4 = por %p205_p2, %p204_p1 }
   0xe   : > { %s187_s29 = ssub.s32 %s983_s22, %s1202_s26  ;;  %p799_p6 = scmp.ge.s32.totalorder %s987_s23, 1 }
   0xf   : > { %p192_p7 = scmp.eq.s32.totalorder %s187_s29, 0  ;;  %p1071_p8 = por %p211_p5, %p210_p3 }
  0x10   : > { %p218_p9 = scmp.lt.s32.totalorder %s987_s23, 3  ;;  %p1083_p11 = scmp.eq.s32.totalorder %s797_s24, 0 }
  0x11   : > { %s1077_s6 = scalar_select %p192_p7, %s975_s20, %s194_s27  }
  0x12   : > { %p1079_p10 = pnand %p799_p6, %p218_p9  ;;  %s1191_s0 = sld [smem:[#allocation12_spill]] }
  0x13   : > { %1188 = sst [smem:[#allocation11_spill]] %s1077_s6 }
  0x14   : > { %p831_p12 = pneg %p1079_p10 }
  0x16   : > { %p832_p13 = pnand %p1083_p11, %p831_p12 }
  0x18   : > { %s231_s11 = sshll.u32 %s1191_s0, 4  ;;  %p896_p1 = pneg %p832_p13  ;;  %s232_s11 = int_to_ptr.vmem [resolvable:$true] %s231_s11 }
  0x19   : > { %s894_s12 = scalar_lea.vmem %s232_s11, 16  ;;  %p902_p5 = scmp.lt.s32.totalorder %s232_s11, %s232_s11 }
  0x1a   : > { %p895_p0 = scmp.ne.s32.totalorder %s232_s11, %s894_s12  ;;  %p903_p6 = scmp.lt.s32.totalorder %s894_s12, %s894_s12 }
  0x1c   : > { %p897_p2 = pnand %p896_p1, %p895_p0  ;;  %p904_p7 = por %p903_p6, %p902_p5 }
  0x1e   : > { %p898_p3 = pneg %p897_p2 }
  0x20   : > { %p905_p9 = pnand %p904_p7, %p898_p3 }
  0x22   : > { %908 = shalt.err (!%p905_p9)
}
  0x23   : > { %s989_s13 = smov [#allocation2]   ;;  %340 = sbr.rel (%p1079_p10) target bundleno = 95 (0x5f), region = 40 }
  0x24   : > { %834 = dma.vmem_to_smem (!%p832_p13), %s232_s11, 16, %s989_s13, [#allocation4]  }
  0x2a   : > { %958 = dma.done.wait (%p1083_p11), [#allocation4], 16  }
  0x2b   : > { %960 = vsyncadd (%p1083_p11), [#allocation4], 4294967280 }
  0x2c   : > { %346 = sfence }
  0x2d   : > { %p435_p12 = scmp.lt.s32.totalorder %s979_s21, 1  ;;  %s1101_s14 = sld [smem:[#allocation2]]  ;;  %v525_v0 = vlaneseq  ;;  %v990_v1 = vmov 1983009808  }
  0x2e   : > { %s1104_s16 = sld [smem:[#allocation2 + $0x1]]  ;;  %s1107_s24 = sld [smem:[#allocation2 + $0x2]]  ;;  %v570_v2 = vunpack.c.l.s4 %v990_v1 }
  0x2f   : > { %s436_s17 = scalar_select %p435_p12, %s979_s21, 1  ;;  %v526_v7 = vshrl.u32 %v525_v0, 7 }
  0x30   : > { %s815_s25 = sld [smem:[#allocation2 + $0x3]]  ;;  %v571_v11 = vunpack.c.0.s8 %v570_v2 }
  0x31   : > { %s821_s27 = sshll.u32 %s436_s17, 3  ;;  %s823_s29 = sshll.u32 %s436_s17, 4  ;;  %vm562_vm0 = vcmp.lt.s32.totalorder %v526_v7, 2 }
  0x32   : > { %s446_s9 = scalar_lea.vmem %s1174_s1, %s821_s27  ;;  %s468_s12 = scalar_lea.vmem %s1175_s2, %s821_s27  ;;  %v574_v29 = vsub.s32 %v571_v11, %v526_v7 }
  0x33   : > { %s486_s0 = scalar_lea.vmem %s1176_s3, %s823_s29  ;;  %s824_s26 = sshll.u32 %s436_s17, 2  ;;  %v519_v3 = vld [vmem:[%s446_s9] sm:$0xff]  ;;  %v522_v4 = vstv %s1101_s14  ;;  %v520_v6 = vld [vmem:[%s446_s9 + $0x8] sm:$0xff] }
  0x34   : > { %v530_v5 = vld [vmem:[%s468_s12] sm:$0xff]  ;;  %s506_s20 = scalar_lea.vmem %s1177_s4, %s824_s26  ;;  %v533_v8 = vstv %s1104_s16  ;;  %v539_v10 = vld [vmem:[%s486_s0 + $0x8] sm:$0xff]  ;;  %v523_v13 = vmul.f32 %v522_v4, %v519_v3  ;;  %v541_v18 = vstv %s1107_s24  ;;  %v524_v21 = vmul.f32 %v522_v4, %v520_v6 }
  0x35   : > { %v538_v9 = vld [vmem:[%s486_s0] sm:$0xff]  ;;  %v531_v12 = vld [vmem:[%s468_s12 + $0x8] sm:$0xff]  ;;  %v534_v17 = vmul.f32 %v533_v8, %v530_v5  ;;  %v543_v23 = vmul.f32 %v541_v18, %v539_v10  ;;  %s1192_s0 = sand.u32 1, %s971_s19  }
  0x36   : > { %v552_v14 = vld [vmem:[%s506_s20] sm:$0xf]  ;;  %v553_v15 = vld [vmem:[%s506_s20 + $0x4] sm:$0xf]  ;;  %v554_v16 = vld [vmem:[%s506_s20 + $0x8] sm:$0xf]  ;;  %v557_v20 = vstv %s815_s25  ;;  %v542_v22 = vmul.f32 %v541_v18, %v538_v9  ;;  %v535_v25 = vmul.f32 %v533_v8, %v531_v12  ;;  %s1193_s26 = smov %s1192_s0 }
  0x37   : > { %v555_v19 = vld [vmem:[%s506_s20 + $0xc] sm:$0xf]  ;;  %v558_v24 = vmul.f32 %v557_v20, %v552_v14  ;;  %v559_v26 = vmul.f32 %v557_v20, %v553_v15  ;;  %v560_v27 = vmul.f32 %v557_v20, %v554_v16  ;;  %v536_v32 = vadd.f32 %v534_v17, %v523_v13  ;;  %s804_s20 = sshll.u32 %s1192_s0, 4  ;;  %s1128_s6 = scalar_lea.sflag [#allocation3], %s1193_s26 }
  0x38   : > { %v561_v28 = vmul.f32 %v557_v20, %v555_v19  ;;  %v546_v33 = vcombine.low %v542_v22, %v543_v23  ;;  %v537_v34 = vadd.f32 %v535_v25, %v524_v21  ;;  %v547_v35 = vcombine.high %v542_v22, %v543_v23  ;;  %s429_s22 = scalar_lea.vmem [#allocation5], %s804_s20 }
  0x39   : > { %v567_v30 = vcombine.low %v558_v24, %v559_v26 }
  0x3a   : > { %v568_v31 = vcombine.low %v560_v27, %v561_v28  ;;  %v550_v40 = vadd.f32 %v546_v33, %v536_v32  ;;  %v551_v41 = vadd.f32 %v547_v35, %v537_v34 }
  0x3b   : > { %v575_v36 = vrot.slane %v567_v30, %v574_v29 }
  0x3c   : > { %v582_v37 = vrot.slane %v568_v31, %v574_v29 }
  0x3e   : > { %v583_v38 = vcombine.low %v575_v36, %v582_v37  ;;  %v584_v39 = vcombine.high %v575_v36, %v582_v37 }
  0x3f   : > { %606 = sbr.rel (!%p1064_p4) target bundleno = 95 (0x5f), region = 48 }
  0x40   : > { %v587_v42 = vsel %vm562_vm0, %v583_v38, 0.0  ;;  %v588_v43 = vsel %vm562_vm0, %v584_v39, 0.0 }
  0x41   : > { %v591_v44 = vcombine.low %v587_v42, %v588_v43  ;;  %v592_v45 = vcombine.high %v587_v42, %v588_v43 }
  0x43   : > { %v595_v46 = vadd.f32 %v591_v44, %v550_v40  ;;  %v596_v47 = vadd.f32 %v592_v45, %v551_v41 }
  0x45   : > { %597 = vst [vmem:[%s429_s22] sm:$0xff] %v595_v46  ;;  %598 = vst [vmem:[%s429_s22 + $0x8] sm:$0xff] %v596_v47 }
  0x46   : > { %614 = vsyncadd %s1128_s6, 128  ;;  %s825_s14 = sshll.u32 %s979_s21, 7  ;;  %s623_s15 = sshll.u32 %s429_s22, 4  ;;  %s624_s15 = int_to_ptr.vmem [resolvable:$true] %s623_s15 }
  0x47   : > { %s1137_s24 = scalar_lea.hbm %s1178_s5, %s825_s14  ;;  %s909_s25 = scalar_lea.vmem %s624_s15, 128 }
  0x48   : > { %p910_p10 = scmp.ne.s32.totalorder %s624_s15, %s909_s25  ;;  %s991_s27 = smov [#allocation5]  }
  0x49   : > { %s911_s29 = sshll.u32 %s991_s27, 4  ;;  %s912_s29 = int_to_ptr.vmem [resolvable:$false] %s911_s29 }
  0x4a   : > { %s913_s7 = scalar_lea.vmem %s912_s29, 512  ;;  %p914_p11 = scmp.lt.s32.totalorder %s624_s15, %s912_s29 }
  0x4b   : > { %p915_p13 = scmp.lt.s32.totalorder %s913_s7, %s909_s25 }
  0x4d   : > { %p916_p4 = por %p915_p13, %p914_p11 }
  0x4f   : > { %p917_p0 = pnand %p916_p4, %p910_p10 }
  0x51   : > { %920 = shalt.err (!%p917_p0)
}
  0x52   : > { %s921_s21 = scalar_lea.hbm %s1137_s24, 128  ;;  %s923_s9 = scalar_lea.hbm %s1178_s5, 256 }
  0x53   : > { %p922_p1 = scmp.ne.s32.totalorder %s1137_s24, %s921_s21  ;;  %p924_p2 = scmp.lt.u32.totalorder %s1137_s24, %s1178_s5 }
  0x54   : > { %p925_p3 = scmp.lt.u32.totalorder %s923_s9, %s921_s21  ;;  %p927_p6 = scmp.lt.u32.totalorder %s921_s21, %s1137_s24 }
  0x56   : > { %p926_p5 = por %p925_p3, %p924_p2 }
  0x58   : > { %p928_p7 = por %p927_p6, %p926_p5 }
  0x5a   : > { %p929_p9 = pnand %p928_p7, %p922_p1 }
  0x5c   : > { %932 = shalt.err (!%p929_p9)
}
  0x5d   : > { %s992_s12 = smov 128   ;;  %s993_s13 = smov 8  }
  0x5e   : > { %629 = dma.vmem_to_hbm [thread:$0]  %s624_s15, 128, %s1137_s24, %s1128_s6, %s992_s12, %s992_s12, %s993_s13  }
  0x5f PF: > { %p841_p12 = scmp.ge.s32.totalorder %s987_s23, 2  ;;  %s638_s0 = sand.u32 1, %s967_s18  }
  0x60   : > { %s639_s20 = scalar_lea.sflag [#allocation3], %s638_s0 }
  0x61   : > { %p836_p10 = pnand %p841_p12, %p1071_p8 }
  0x63   : > { %962 = dma.done.wait (!%p836_p10), %s639_s20, 256  }
  0x64   : > { %964 = vsyncadd (!%p836_p10), %s639_s20, 4294967040  ;;  %s19_s23 = sadd.s32 1, %s987_s23   ;;  %s1194_s22 = sld [smem:[#allocation8_spill]] }
  0x65   : > { %p16_p11 = scmp.ge.s32.totalorder %s19_s23, 4   ;;  %s1195_s20 = sld [smem:[#allocation11_spill]] }
  0x66   : > { %s1196_s21 = sld [smem:[#allocation9_spill]]  ;;  %s1197_s26 = sld [smem:[#allocation10_spill]] }
  0x67   : > { %s1198_s18 = smov %s971_s19  ;;  %18 = sbr.rel (!%p16_p11) target bundleno = 7 (0x7), region = 89 }
  0x6a   : > { %s1199_s19 = smov %s1194_s22 }
  0x6c   : > { %s1200_s22 = smov %s1197_s26 }
  0x6e   :  { %644 = vsyncpa [#allocation3], 1 }
  0x6f   :  { %646 = vsyncpa [#allocation3 + $0x1], 1 }
  0x70   :  { %647 = vsyncpa [#allocation4], 1 }
  0x71   :  { %649 = vsyncpa [#allocation4 + $0x1], 1 }

</bundles_post_ra>
